<compile_context>
chip_gen: v5e
topology: v5e:2x2
jax: 0.10.0
libtpu: 0.0.40
codegen_flags: <defaults>
</compile_context>

<pallas_src>
import functools

import jax
import jax.numpy as jnp
from jax.experimental import pallas as pl
from jax.experimental.pallas import tpu as pltpu


def _sam_fused_kernel(fx_ref, x_ref, w12_ref, w3_ref, mask_ref,
                      pred_ref, img_ref,
                      acc_ref, col_ref, *, H, W, K, C):
    """Fused SAM forward for one batch element.

    fx_ref  : (C, H*W)        feature input (flattened spatial on lanes)
    x_ref   : (3, H*W)        original image
    w12_ref : (K*K, C+3, C)   bf16 stacked conv1/conv2 per-tap matrices
    w3_ref  : (C, K*K*3)      f32 conv3 matrix (tap-major, cin-minor columns)
    mask_ref: (K*K, H*W)      f32 per-tap validity mask (1 valid / 0 padding)
    pred_ref: (C, H*W)        output
    img_ref : (3, H*W)        output
    acc_ref : (C+3, H*W) f32  fused conv1+conv2 accumulator scratch
    col_ref : (K*K*3, H*W) f32 im2col scratch for conv3
    """
    p = K // 2
    HW = H * W

    fx = fx_ref[...].astype(jnp.float32)                     # (C, HW)

    # ---- stage 1: conv1 (C->C) and conv2 (C->3) fused, one matmul per tap ----
    # For tap (kh, kw) the shifted window is a lane-roll of the flat fx slab;
    # lanes whose source pixel falls outside the image (H or W boundary) are
    # zeroed by the precomputed per-tap mask (== zero padding).
    for kh in range(K):
        for kw in range(K):
            t = kh * K + kw
            s = (kh - p) * W + (kw - p)                       # flat source offset
            if s == 0:
                win = fx                                      # center tap: no shift/mask
            else:
                win = pltpu.roll(fx, (-s) % HW, 1) * mask_ref[t:t + 1, :]
            contrib = jnp.dot(w12_ref[t], win.astype(jnp.bfloat16),
                              preferred_element_type=jnp.float32)  # (C+3, HW)
            if t == 0:
                acc_ref[...] = contrib                        # no separate zero-fill pass
            else:
                acc_ref[...] += contrib

    x1 = acc_ref[0:C, :]                                      # conv1(fx), f32
    img = acc_ref[C:C + 3, :] + x_ref[...].astype(jnp.float32)
    img_ref[...] = img.astype(img_ref.dtype)

    # ---- stage 2: conv3 (3->C) as ONE 27-deep contraction via im2col ----
    for kh in range(K):
        for kw in range(K):
            t = kh * K + kw
            s = (kh - p) * W + (kw - p)
            if s == 0:
                win = img
            else:
                win = pltpu.roll(img, (-s) % HW, 1) * mask_ref[t:t + 1, :]
            col_ref[3 * t:3 * t + 3, :] = win                 # rows [3t .. 3t+2]

    conv3 = jnp.dot(w3_ref[...], col_ref[...],
                    preferred_element_type=jnp.float32)       # (C, HW)
    x2 = jax.nn.sigmoid(conv3)
    pred_ref[...] = (x1 * x2 + fx).astype(pred_ref.dtype)


def supervised_attention_module(fx, x, w1, w2, w3):
    """fx: (B, C, H, W); x: (B, 3, H, W); w*: (K, K, Cin, Cout) HWIO, bias=False."""
    B, C, H, W = fx.shape
    K = w1.shape[0]
    p = K // 2
    HW = H * W
    KK = K * K

    # Free metadata-only reshapes: put H*W on the lane axis (lane-dense I/O).
    fx_f = fx.reshape(B, C, HW)
    x_f = x.reshape(B, 3, HW)

    # Stacked conv1+conv2 per-tap matrices: (K*K, C+3, C), rows 0..C-1 = conv1
    # out-channels, rows C..C+2 = conv2 out-channels.  bf16 operands -> native
    # MXU rate, f32 accumulation in-kernel.
    w1_t = jnp.transpose(w1, (0, 1, 3, 2)).reshape(KK, C, C)
    w2_t = jnp.transpose(w2, (0, 1, 3, 2)).reshape(KK, 3, C)
    w12 = jnp.concatenate([w1_t, w2_t], axis=1).astype(jnp.bfloat16)

    # conv3 as one (C, K*K*3) matrix; column order matches the im2col scratch
    # row order: flat = 3*tap + cin.
    w3_m = jnp.transpose(w3, (3, 0, 1, 2)).reshape(C, KK * 3).astype(jnp.float32)

    # Combined per-tap validity mask (K*K, HW): tap (kh, kw) reads source pixel
    # (h + kh - p, w + kw - p); mask is 0 where that pixel is outside the image
    # (so the rolled window's wrapped lanes contribute exactly zero padding).
    row = jnp.arange(HW, dtype=jnp.int32) // W
    col = jnp.arange(HW, dtype=jnp.int32) % W
    d = jnp.arange(K, dtype=jnp.int32) - p
    vh = ((row[None, :] + d[:, None]) >= 0) & ((row[None, :] + d[:, None]) < H)  # (K, HW)
    vw = ((col[None, :] + d[:, None]) >= 0) & ((col[None, :] + d[:, None]) < W)  # (K, HW)
    mask = (vh[:, None, :] & vw[None, :, :]).reshape(KK, HW).astype(jnp.float32)

    itemsize = jnp.dtype(fx.dtype).itemsize
    cost = pl.CostEstimate(
        flops=int(2 * B * HW * (KK * (C + 3) * C + KK * 3 * C)),
        transcendentals=int(B * C * HW),
        bytes_accessed=int(
            2 * B * C * HW * itemsize + 2 * B * 3 * HW * itemsize   # fx/pred, x/img
            + KK * (C + 3) * C * 2 + C * KK * 3 * 4 + KK * HW * 4), # weights + mask
    )

    def const(*s):
        return pl.BlockSpec(s, lambda b, _n=len(s): (0,) * _n)

    kernel = functools.partial(_sam_fused_kernel, H=H, W=W, K=K, C=C)
    pred_f, img_f = pl.pallas_call(
        kernel,
        out_shape=(
            jax.ShapeDtypeStruct((B, C, HW), fx.dtype),
            jax.ShapeDtypeStruct((B, 3, HW), fx.dtype),
        ),
        grid_spec=pltpu.PrefetchScalarGridSpec(
            num_scalar_prefetch=0,
            grid=(B,),
            in_specs=[
                pl.BlockSpec((None, C, HW), lambda b: (b, 0, 0)),   # fx
                pl.BlockSpec((None, 3, HW), lambda b: (b, 0, 0)),   # x
                const(KK, C + 3, C),                                # stacked w1|w2 taps
                const(C, KK * 3),                                   # conv3 matrix
                const(KK, HW),                                      # per-tap mask
            ],
            out_specs=(
                pl.BlockSpec((None, C, HW), lambda b: (b, 0, 0)),   # pred
                pl.BlockSpec((None, 3, HW), lambda b: (b, 0, 0)),   # img
            ),
            scratch_shapes=[
                pltpu.VMEM((C + 3, HW), jnp.float32),   # fused conv1+conv2 accumulator
                pltpu.VMEM((KK * 3, HW), jnp.float32),  # conv3 im2col
            ],
        ),
        compiler_params=pltpu.CompilerParams(
            dimension_semantics=("parallel",),
            vmem_limit_bytes=64 * 1024 * 1024),
        cost_estimate=cost,
    )(fx_f, x_f, w12, w3_m, mask)

    return pred_f.reshape(B, C, H, W), img_f.reshape(B, 3, H, W)


def _ref_forward(fx, x, w1, w2, w3):
    """Pure-JAX reference (lax conv, highest precision) for correctness checking."""
    def conv(inp, w):
        return jax.lax.conv_general_dilated(
            inp, w, window_strides=(1, 1), padding="SAME",
            dimension_numbers=("NCHW", "HWIO", "NCHW"),
            precision=jax.lax.Precision.HIGHEST)
    x1 = conv(fx, w1)
    img = conv(fx, w2) + x
    x2 = jax.nn.sigmoid(conv(img, w3))
    return x1 * x2 + fx, img


if __name__ == "__main__":
    B, C, H, W = 2, 4, 16, 16
    K = 3  # kernel_size=3 -> padding=1

    key = jax.random.PRNGKey(0)
    k_fx, k_x, k1, k2, k3 = jax.random.split(key, 5)
    fx = jax.random.normal(k_fx, (B, C, H, W), jnp.float32)
    x = jax.random.normal(k_x, (B, 3, H, W), jnp.float32)

    # Deterministic synthetic conv weights (bias=False in the module),
    # kaiming-like scale, stored HWIO = (K, K, Cin, Cout).
    w1 = jax.random.normal(k1, (K, K, C, C), jnp.float32) * (1.0 / (K * K * C)) ** 0.5
    w2 = jax.random.normal(k2, (K, K, C, 3), jnp.float32) * (1.0 / (K * K * C)) ** 0.5
    w3 = jax.random.normal(k3, (K, K, 3, C), jnp.float32) * (1.0 / (K * K * 3)) ** 0.5

    pred, img = jax.jit(supervised_attention_module)(fx, x, w1, w2, w3)
    pred = jax.block_until_ready(pred)
    img = jax.block_until_ready(img)

    pred_ref, img_ref = _ref_forward(fx, x, w1, w2, w3)
    assert pred.shape == (B, C, H, W) and img.shape == (B, 3, H, W)
    # Tolerance covers bf16 MXU operands in stage 1 (f32 accumulation); any
    # indexing / masking bug would produce O(1) errors.
    assert jnp.allclose(img, img_ref, atol=2.5e-2, rtol=2.5e-2)
    assert jnp.allclose(pred, pred_ref, atol=2.5e-2, rtol=2.5e-2)

    print("KERNEL_OK")
</pallas_src>

<mosaic_0001>
module attributes {stable_mosaic.version = 11 : i64} {
  func.func @_sam_fused_kernel(%arg0: i32, %arg1: memref<1x4x256xf32, #tpu.memory_space<vmem>>, %arg2: memref<1x3x256xf32, #tpu.memory_space<vmem>>, %arg3: memref<9x7x4xbf16, #tpu.memory_space<vmem>>, %arg4: memref<4x27xf32, #tpu.memory_space<vmem>>, %arg5: memref<9x256xf32, #tpu.memory_space<vmem>>, %arg6: memref<1x4x256xf32, #tpu.memory_space<vmem>>, %arg7: memref<1x3x256xf32, #tpu.memory_space<vmem>>, %arg8: memref<7x256xf32, #tpu.memory_space<vmem>>, %arg9: memref<27x256xf32, #tpu.memory_space<vmem>>) attributes {dimension_semantics = [#tpu.dimension_semantics<parallel>], iteration_bounds = array<i64: 2>, scalar_prefetch = 0 : i64, scratch_operands = 2 : i64, tpu.core_type = #tpu.core_type<tc>, window_params = [{transform_indices = @transform_0, window_bounds = array<i64: 1, 4, 256>}, {transform_indices = @transform_1, window_bounds = array<i64: 1, 3, 256>}, {pipeline_mode = #tpu.pipeline_mode<synchronous>, transform_indices = @transform_2, window_bounds = array<i64: 9, 7, 4>}, {pipeline_mode = #tpu.pipeline_mode<synchronous>, transform_indices = @transform_3, window_bounds = array<i64: 4, 27>}, {pipeline_mode = #tpu.pipeline_mode<synchronous>, transform_indices = @transform_4, window_bounds = array<i64: 9, 256>}, {transform_indices = @transform_5, window_bounds = array<i64: 1, 4, 256>}, {transform_indices = @transform_6, window_bounds = array<i64: 1, 3, 256>}]} {
    %c0 = arith.constant 0 : index
    %c0_0 = arith.constant 0 : index
    %c0_1 = arith.constant 0 : index
    %0 = vector.load %arg1[%c0, %c0_0, %c0_1] : memref<1x4x256xf32, #tpu.memory_space<vmem>>, vector<1x4x256xf32>
    %1 = vector.shape_cast %0 : vector<1x4x256xf32> to vector<4x256xf32>
    %c17_i32 = arith.constant 17 : i32
    %2 = tpu.dynamic_rotate %1 by %c17_i32 dim 1 : vector<4x256xf32>, i32 -> vector<4x256xf32>
    %c0_2 = arith.constant 0 : index
    %c0_3 = arith.constant 0 : index
    %3 = vector.load %arg5[%c0_2, %c0_3] : memref<9x256xf32, #tpu.memory_space<vmem>>, vector<1x256xf32>
    %4 = vector.broadcast %3 : vector<1x256xf32> to vector<4x256xf32>
    %5 = arith.mulf %2, %4 : vector<4x256xf32>
    %c0_4 = arith.constant 0 : index
    %c0_5 = arith.constant 0 : index
    %c0_6 = arith.constant 0 : index
    %6 = vector.load %arg3[%c0_4, %c0_5, %c0_6] : memref<9x7x4xbf16, #tpu.memory_space<vmem>>, vector<1x7x4xbf16>
    %7 = vector.shape_cast %6 : vector<1x7x4xbf16> to vector<7x4xbf16>
    %8 = arith.truncf %5 : vector<4x256xf32> to vector<4x256xbf16>
    %cst = arith.constant dense<0.000000e+00> : vector<7x256xf32>
    %9 = tpu.matmul %7, %8, %cst {dimension_numbers = #tpu.dot_dimension_numbers<[1], [0], [0], [1], [0, 0, 1, 1], [], []>} : vector<7x4xbf16>, vector<4x256xbf16>, vector<7x256xf32> -> vector<7x256xf32>
    %c0_7 = arith.constant 0 : index
    %c0_8 = arith.constant 0 : index
    %10 = vector.load %arg8[%c0_7, %c0_8] : memref<7x256xf32, #tpu.memory_space<vmem>>, vector<7x256xf32>
    tpu.vector_store %arg8[%c0_7, %c0_8], %9 {strides = array<i32>} : memref<7x256xf32, #tpu.memory_space<vmem>>, vector<7x256xf32>,
    %c16_i32 = arith.constant 16 : i32
    %11 = tpu.dynamic_rotate %1 by %c16_i32 dim 1 : vector<4x256xf32>, i32 -> vector<4x256xf32>
    %c1 = arith.constant 1 : index
    %c0_9 = arith.constant 0 : index
    %12 = vector.load %arg5[%c1, %c0_9] : memref<9x256xf32, #tpu.memory_space<vmem>>, vector<1x256xf32>
    %13 = vector.broadcast %12 : vector<1x256xf32> to vector<4x256xf32>
    %14 = arith.mulf %11, %13 : vector<4x256xf32>
    %c1_10 = arith.constant 1 : index
    %c0_11 = arith.constant 0 : index
    %c0_12 = arith.constant 0 : index
    %15 = vector.load %arg3[%c1_10, %c0_11, %c0_12] : memref<9x7x4xbf16, #tpu.memory_space<vmem>>, vector<1x7x4xbf16>
    %16 = vector.shape_cast %15 : vector<1x7x4xbf16> to vector<7x4xbf16>
    %17 = arith.truncf %14 : vector<4x256xf32> to vector<4x256xbf16>
    %cst_13 = arith.constant dense<0.000000e+00> : vector<7x256xf32>
    %18 = tpu.matmul %16, %17, %cst_13 {dimension_numbers = #tpu.dot_dimension_numbers<[1], [0], [0], [1], [0, 0, 1, 1], [], []>} : vector<7x4xbf16>, vector<4x256xbf16>, vector<7x256xf32> -> vector<7x256xf32>
    %c0_14 = arith.constant 0 : index
    %c0_15 = arith.constant 0 : index
    %19 = vector.load %arg8[%c0_14, %c0_15] : memref<7x256xf32, #tpu.memory_space<vmem>>, vector<7x256xf32>
    %20 = arith.addf %19, %18 : vector<7x256xf32>
    %c0_16 = arith.constant 0 : index
    %c0_17 = arith.constant 0 : index
    %21 = vector.load %arg8[%c0_16, %c0_17] : memref<7x256xf32, #tpu.memory_space<vmem>>, vector<7x256xf32>
    tpu.vector_store %arg8[%c0_16, %c0_17], %20 {strides = array<i32>} : memref<7x256xf32, #tpu.memory_space<vmem>>, vector<7x256xf32>,
    %c15_i32 = arith.constant 15 : i32
    %22 = tpu.dynamic_rotate %1 by %c15_i32 dim 1 : vector<4x256xf32>, i32 -> vector<4x256xf32>
    %c2 = arith.constant 2 : index
    %c0_18 = arith.constant 0 : index
    %23 = vector.load %arg5[%c2, %c0_18] : memref<9x256xf32, #tpu.memory_space<vmem>>, vector<1x256xf32>
    %24 = vector.broadcast %23 : vector<1x256xf32> to vector<4x256xf32>
    %25 = arith.mulf %22, %24 : vector<4x256xf32>
    %c2_19 = arith.constant 2 : index
    %c0_20 = arith.constant 0 : index
    %c0_21 = arith.constant 0 : index
    %26 = vector.load %arg3[%c2_19, %c0_20, %c0_21] : memref<9x7x4xbf16, #tpu.memory_space<vmem>>, vector<1x7x4xbf16>
    %27 = vector.shape_cast %26 : vector<1x7x4xbf16> to vector<7x4xbf16>
    %28 = arith.truncf %25 : vector<4x256xf32> to vector<4x256xbf16>
    %cst_22 = arith.constant dense<0.000000e+00> : vector<7x256xf32>
    %29 = tpu.matmul %27, %28, %cst_22 {dimension_numbers = #tpu.dot_dimension_numbers<[1], [0], [0], [1], [0, 0, 1, 1], [], []>} : vector<7x4xbf16>, vector<4x256xbf16>, vector<7x256xf32> -> vector<7x256xf32>
    %c0_23 = arith.constant 0 : index
    %c0_24 = arith.constant 0 : index
    %30 = vector.load %arg8[%c0_23, %c0_24] : memref<7x256xf32, #tpu.memory_space<vmem>>, vector<7x256xf32>
    %31 = arith.addf %30, %29 : vector<7x256xf32>
    %c0_25 = arith.constant 0 : index
    %c0_26 = arith.constant 0 : index
    %32 = vector.load %arg8[%c0_25, %c0_26] : memref<7x256xf32, #tpu.memory_space<vmem>>, vector<7x256xf32>
    tpu.vector_store %arg8[%c0_25, %c0_26], %31 {strides = array<i32>} : memref<7x256xf32, #tpu.memory_space<vmem>>, vector<7x256xf32>,
    %c1_i32 = arith.constant 1 : i32
    %33 = tpu.dynamic_rotate %1 by %c1_i32 dim 1 : vector<4x256xf32>, i32 -> vector<4x256xf32>
    %c3 = arith.constant 3 : index
    %c0_27 = arith.constant 0 : index
    %34 = vector.load %arg5[%c3, %c0_27] : memref<9x256xf32, #tpu.memory_space<vmem>>, vector<1x256xf32>
    %35 = vector.broadcast %34 : vector<1x256xf32> to vector<4x256xf32>
    %36 = arith.mulf %33, %35 : vector<4x256xf32>
    %c3_28 = arith.constant 3 : index
    %c0_29 = arith.constant 0 : index
    %c0_30 = arith.constant 0 : index
    %37 = vector.load %arg3[%c3_28, %c0_29, %c0_30] : memref<9x7x4xbf16, #tpu.memory_space<vmem>>, vector<1x7x4xbf16>
    %38 = vector.shape_cast %37 : vector<1x7x4xbf16> to vector<7x4xbf16>
    %39 = arith.truncf %36 : vector<4x256xf32> to vector<4x256xbf16>
    %cst_31 = arith.constant dense<0.000000e+00> : vector<7x256xf32>
    %40 = tpu.matmul %38, %39, %cst_31 {dimension_numbers = #tpu.dot_dimension_numbers<[1], [0], [0], [1], [0, 0, 1, 1], [], []>} : vector<7x4xbf16>, vector<4x256xbf16>, vector<7x256xf32> -> vector<7x256xf32>
    %c0_32 = arith.constant 0 : index
    %c0_33 = arith.constant 0 : index
    %41 = vector.load %arg8[%c0_32, %c0_33] : memref<7x256xf32, #tpu.memory_space<vmem>>, vector<7x256xf32>
    %42 = arith.addf %41, %40 : vector<7x256xf32>
    %c0_34 = arith.constant 0 : index
    %c0_35 = arith.constant 0 : index
    %43 = vector.load %arg8[%c0_34, %c0_35] : memref<7x256xf32, #tpu.memory_space<vmem>>, vector<7x256xf32>
    tpu.vector_store %arg8[%c0_34, %c0_35], %42 {strides = array<i32>} : memref<7x256xf32, #tpu.memory_space<vmem>>, vector<7x256xf32>,
    %c4 = arith.constant 4 : index
    %c0_36 = arith.constant 0 : index
    %c0_37 = arith.constant 0 : index
    %44 = vector.load %arg3[%c4, %c0_36, %c0_37] : memref<9x7x4xbf16, #tpu.memory_space<vmem>>, vector<1x7x4xbf16>
    %45 = vector.shape_cast %44 : vector<1x7x4xbf16> to vector<7x4xbf16>
    %46 = arith.truncf %1 : vector<4x256xf32> to vector<4x256xbf16>
    %cst_38 = arith.constant dense<0.000000e+00> : vector<7x256xf32>
    %47 = tpu.matmul %45, %46, %cst_38 {dimension_numbers = #tpu.dot_dimension_numbers<[1], [0], [0], [1], [0, 0, 1, 1], [], []>} : vector<7x4xbf16>, vector<4x256xbf16>, vector<7x256xf32> -> vector<7x256xf32>
    %c0_39 = arith.constant 0 : index
    %c0_40 = arith.constant 0 : index
    %48 = vector.load %arg8[%c0_39, %c0_40] : memref<7x256xf32, #tpu.memory_space<vmem>>, vector<7x256xf32>
    %49 = arith.addf %48, %47 : vector<7x256xf32>
    %c0_41 = arith.constant 0 : index
    %c0_42 = arith.constant 0 : index
    %50 = vector.load %arg8[%c0_41, %c0_42] : memref<7x256xf32, #tpu.memory_space<vmem>>, vector<7x256xf32>
    tpu.vector_store %arg8[%c0_41, %c0_42], %49 {strides = array<i32>} : memref<7x256xf32, #tpu.memory_space<vmem>>, vector<7x256xf32>,
    %c255_i32 = arith.constant 255 : i32
    %51 = tpu.dynamic_rotate %1 by %c255_i32 dim 1 : vector<4x256xf32>, i32 -> vector<4x256xf32>
    %c5 = arith.constant 5 : index
    %c0_43 = arith.constant 0 : index
    %52 = vector.load %arg5[%c5, %c0_43] : memref<9x256xf32, #tpu.memory_space<vmem>>, vector<1x256xf32>
    %53 = vector.broadcast %52 : vector<1x256xf32> to vector<4x256xf32>
    %54 = arith.mulf %51, %53 : vector<4x256xf32>
    %c5_44 = arith.constant 5 : index
    %c0_45 = arith.constant 0 : index
    %c0_46 = arith.constant 0 : index
    %55 = vector.load %arg3[%c5_44, %c0_45, %c0_46] : memref<9x7x4xbf16, #tpu.memory_space<vmem>>, vector<1x7x4xbf16>
    %56 = vector.shape_cast %55 : vector<1x7x4xbf16> to vector<7x4xbf16>
    %57 = arith.truncf %54 : vector<4x256xf32> to vector<4x256xbf16>
    %cst_47 = arith.constant dense<0.000000e+00> : vector<7x256xf32>
    %58 = tpu.matmul %56, %57, %cst_47 {dimension_numbers = #tpu.dot_dimension_numbers<[1], [0], [0], [1], [0, 0, 1, 1], [], []>} : vector<7x4xbf16>, vector<4x256xbf16>, vector<7x256xf32> -> vector<7x256xf32>
    %c0_48 = arith.constant 0 : index
    %c0_49 = arith.constant 0 : index
    %59 = vector.load %arg8[%c0_48, %c0_49] : memref<7x256xf32, #tpu.memory_space<vmem>>, vector<7x256xf32>
    %60 = arith.addf %59, %58 : vector<7x256xf32>
    %c0_50 = arith.constant 0 : index
    %c0_51 = arith.constant 0 : index
    %61 = vector.load %arg8[%c0_50, %c0_51] : memref<7x256xf32, #tpu.memory_space<vmem>>, vector<7x256xf32>
    tpu.vector_store %arg8[%c0_50, %c0_51], %60 {strides = array<i32>} : memref<7x256xf32, #tpu.memory_space<vmem>>, vector<7x256xf32>,
    %c241_i32 = arith.constant 241 : i32
    %62 = tpu.dynamic_rotate %1 by %c241_i32 dim 1 : vector<4x256xf32>, i32 -> vector<4x256xf32>
    %c6 = arith.constant 6 : index
    %c0_52 = arith.constant 0 : index
    %63 = vector.load %arg5[%c6, %c0_52] : memref<9x256xf32, #tpu.memory_space<vmem>>, vector<1x256xf32>
    %64 = vector.broadcast %63 : vector<1x256xf32> to vector<4x256xf32>
    %65 = arith.mulf %62, %64 : vector<4x256xf32>
    %c6_53 = arith.constant 6 : index
    %c0_54 = arith.constant 0 : index
    %c0_55 = arith.constant 0 : index
    %66 = vector.load %arg3[%c6_53, %c0_54, %c0_55] : memref<9x7x4xbf16, #tpu.memory_space<vmem>>, vector<1x7x4xbf16>
    %67 = vector.shape_cast %66 : vector<1x7x4xbf16> to vector<7x4xbf16>
    %68 = arith.truncf %65 : vector<4x256xf32> to vector<4x256xbf16>
    %cst_56 = arith.constant dense<0.000000e+00> : vector<7x256xf32>
    %69 = tpu.matmul %67, %68, %cst_56 {dimension_numbers = #tpu.dot_dimension_numbers<[1], [0], [0], [1], [0, 0, 1, 1], [], []>} : vector<7x4xbf16>, vector<4x256xbf16>, vector<7x256xf32> -> vector<7x256xf32>
    %c0_57 = arith.constant 0 : index
    %c0_58 = arith.constant 0 : index
    %70 = vector.load %arg8[%c0_57, %c0_58] : memref<7x256xf32, #tpu.memory_space<vmem>>, vector<7x256xf32>
    %71 = arith.addf %70, %69 : vector<7x256xf32>
    %c0_59 = arith.constant 0 : index
    %c0_60 = arith.constant 0 : index
    %72 = vector.load %arg8[%c0_59, %c0_60] : memref<7x256xf32, #tpu.memory_space<vmem>>, vector<7x256xf32>
    tpu.vector_store %arg8[%c0_59, %c0_60], %71 {strides = array<i32>} : memref<7x256xf32, #tpu.memory_space<vmem>>, vector<7x256xf32>,
    %c240_i32 = arith.constant 240 : i32
    %73 = tpu.dynamic_rotate %1 by %c240_i32 dim 1 : vector<4x256xf32>, i32 -> vector<4x256xf32>
    %c7 = arith.constant 7 : index
    %c0_61 = arith.constant 0 : index
    %74 = vector.load %arg5[%c7, %c0_61] : memref<9x256xf32, #tpu.memory_space<vmem>>, vector<1x256xf32>
    %75 = vector.broadcast %74 : vector<1x256xf32> to vector<4x256xf32>
    %76 = arith.mulf %73, %75 : vector<4x256xf32>
    %c7_62 = arith.constant 7 : index
    %c0_63 = arith.constant 0 : index
    %c0_64 = arith.constant 0 : index
    %77 = vector.load %arg3[%c7_62, %c0_63, %c0_64] : memref<9x7x4xbf16, #tpu.memory_space<vmem>>, vector<1x7x4xbf16>
    %78 = vector.shape_cast %77 : vector<1x7x4xbf16> to vector<7x4xbf16>
    %79 = arith.truncf %76 : vector<4x256xf32> to vector<4x256xbf16>
    %cst_65 = arith.constant dense<0.000000e+00> : vector<7x256xf32>
    %80 = tpu.matmul %78, %79, %cst_65 {dimension_numbers = #tpu.dot_dimension_numbers<[1], [0], [0], [1], [0, 0, 1, 1], [], []>} : vector<7x4xbf16>, vector<4x256xbf16>, vector<7x256xf32> -> vector<7x256xf32>
    %c0_66 = arith.constant 0 : index
    %c0_67 = arith.constant 0 : index
    %81 = vector.load %arg8[%c0_66, %c0_67] : memref<7x256xf32, #tpu.memory_space<vmem>>, vector<7x256xf32>
    %82 = arith.addf %81, %80 : vector<7x256xf32>
    %c0_68 = arith.constant 0 : index
    %c0_69 = arith.constant 0 : index
    %83 = vector.load %arg8[%c0_68, %c0_69] : memref<7x256xf32, #tpu.memory_space<vmem>>, vector<7x256xf32>
    tpu.vector_store %arg8[%c0_68, %c0_69], %82 {strides = array<i32>} : memref<7x256xf32, #tpu.memory_space<vmem>>, vector<7x256xf32>,
    %c239_i32 = arith.constant 239 : i32
    %84 = tpu.dynamic_rotate %1 by %c239_i32 dim 1 : vector<4x256xf32>, i32 -> vector<4x256xf32>
    %c8 = arith.constant 8 : index
    %c0_70 = arith.constant 0 : index
    %85 = vector.load %arg5[%c8, %c0_70] : memref<9x256xf32, #tpu.memory_space<vmem>>, vector<1x256xf32>
    %86 = vector.broadcast %85 : vector<1x256xf32> to vector<4x256xf32>
    %87 = arith.mulf %84, %86 : vector<4x256xf32>
    %c8_71 = arith.constant 8 : index
    %c0_72 = arith.constant 0 : index
    %c0_73 = arith.constant 0 : index
    %88 = vector.load %arg3[%c8_71, %c0_72, %c0_73] : memref<9x7x4xbf16, #tpu.memory_space<vmem>>, vector<1x7x4xbf16>
    %89 = vector.shape_cast %88 : vector<1x7x4xbf16> to vector<7x4xbf16>
    %90 = arith.truncf %87 : vector<4x256xf32> to vector<4x256xbf16>
    %cst_74 = arith.constant dense<0.000000e+00> : vector<7x256xf32>
    %91 = tpu.matmul %89, %90, %cst_74 {dimension_numbers = #tpu.dot_dimension_numbers<[1], [0], [0], [1], [0, 0, 1, 1], [], []>} : vector<7x4xbf16>, vector<4x256xbf16>, vector<7x256xf32> -> vector<7x256xf32>
    %c0_75 = arith.constant 0 : index
    %c0_76 = arith.constant 0 : index
    %92 = vector.load %arg8[%c0_75, %c0_76] : memref<7x256xf32, #tpu.memory_space<vmem>>, vector<7x256xf32>
    %93 = arith.addf %92, %91 : vector<7x256xf32>
    %c0_77 = arith.constant 0 : index
    %c0_78 = arith.constant 0 : index
    %94 = vector.load %arg8[%c0_77, %c0_78] : memref<7x256xf32, #tpu.memory_space<vmem>>, vector<7x256xf32>
    tpu.vector_store %arg8[%c0_77, %c0_78], %93 {strides = array<i32>} : memref<7x256xf32, #tpu.memory_space<vmem>>, vector<7x256xf32>,
    %c0_79 = arith.constant 0 : index
    %c0_80 = arith.constant 0 : index
    %95 = vector.load %arg8[%c0_79, %c0_80] : memref<7x256xf32, #tpu.memory_space<vmem>>, vector<4x256xf32>
    %c4_81 = arith.constant 4 : index
    %c0_82 = arith.constant 0 : index
    %96 = vector.load %arg8[%c4_81, %c0_82] : memref<7x256xf32, #tpu.memory_space<vmem>>, vector<3x256xf32>
    %c0_83 = arith.constant 0 : index
    %c0_84 = arith.constant 0 : index
    %c0_85 = arith.constant 0 : index
    %97 = vector.load %arg2[%c0_83, %c0_84, %c0_85] : memref<1x3x256xf32, #tpu.memory_space<vmem>>, vector<1x3x256xf32>
    %98 = vector.shape_cast %97 : vector<1x3x256xf32> to vector<3x256xf32>
    %99 = arith.addf %96, %98 : vector<3x256xf32>
    %c0_86 = arith.constant 0 : index
    %c0_87 = arith.constant 0 : index
    %c0_88 = arith.constant 0 : index
    %100 = vector.load %arg7[%c0_86, %c0_87, %c0_88] : memref<1x3x256xf32, #tpu.memory_space<vmem>>, vector<1x3x256xf32>
    %101 = vector.shape_cast %100 : vector<1x3x256xf32> to vector<3x256xf32>
    %102 = vector.shape_cast %99 : vector<3x256xf32> to vector<1x3x256xf32>
    tpu.vector_store %arg7[%c0_86, %c0_87, %c0_88], %102 {strides = array<i32>} : memref<1x3x256xf32, #tpu.memory_space<vmem>>, vector<1x3x256xf32>,
    %c17_i32_89 = arith.constant 17 : i32
    %103 = tpu.dynamic_rotate %99 by %c17_i32_89 dim 1 : vector<3x256xf32>, i32 -> vector<3x256xf32>
    %c0_90 = arith.constant 0 : index
    %c0_91 = arith.constant 0 : index
    %104 = vector.load %arg5[%c0_90, %c0_91] : memref<9x256xf32, #tpu.memory_space<vmem>>, vector<1x256xf32>
    %105 = vector.broadcast %104 : vector<1x256xf32> to vector<3x256xf32>
    %106 = arith.mulf %103, %105 : vector<3x256xf32>
    %c0_92 = arith.constant 0 : index
    %c0_93 = arith.constant 0 : index
    %107 = vector.load %arg9[%c0_92, %c0_93] : memref<27x256xf32, #tpu.memory_space<vmem>>, vector<3x256xf32>
    tpu.vector_store %arg9[%c0_92, %c0_93], %106 {strides = array<i32>} : memref<27x256xf32, #tpu.memory_space<vmem>>, vector<3x256xf32>,
    %c16_i32_94 = arith.constant 16 : i32
    %108 = tpu.dynamic_rotate %99 by %c16_i32_94 dim 1 : vector<3x256xf32>, i32 -> vector<3x256xf32>
    %c1_95 = arith.constant 1 : index
    %c0_96 = arith.constant 0 : index
    %109 = vector.load %arg5[%c1_95, %c0_96] : memref<9x256xf32, #tpu.memory_space<vmem>>, vector<1x256xf32>
    %110 = vector.broadcast %109 : vector<1x256xf32> to vector<3x256xf32>
    %111 = arith.mulf %108, %110 : vector<3x256xf32>
    %c3_97 = arith.constant 3 : index
    %c0_98 = arith.constant 0 : index
    %112 = vector.load %arg9[%c3_97, %c0_98] : memref<27x256xf32, #tpu.memory_space<vmem>>, vector<3x256xf32>
    tpu.vector_store %arg9[%c3_97, %c0_98], %111 {strides = array<i32>} : memref<27x256xf32, #tpu.memory_space<vmem>>, vector<3x256xf32>,
    %c15_i32_99 = arith.constant 15 : i32
    %113 = tpu.dynamic_rotate %99 by %c15_i32_99 dim 1 : vector<3x256xf32>, i32 -> vector<3x256xf32>
    %c2_100 = arith.constant 2 : index
    %c0_101 = arith.constant 0 : index
    %114 = vector.load %arg5[%c2_100, %c0_101] : memref<9x256xf32, #tpu.memory_space<vmem>>, vector<1x256xf32>
    %115 = vector.broadcast %114 : vector<1x256xf32> to vector<3x256xf32>
    %116 = arith.mulf %113, %115 : vector<3x256xf32>
    %c6_102 = arith.constant 6 : index
    %c0_103 = arith.constant 0 : index
    %117 = vector.load %arg9[%c6_102, %c0_103] : memref<27x256xf32, #tpu.memory_space<vmem>>, vector<3x256xf32>
    tpu.vector_store %arg9[%c6_102, %c0_103], %116 {strides = array<i32>} : memref<27x256xf32, #tpu.memory_space<vmem>>, vector<3x256xf32>,
    %c1_i32_104 = arith.constant 1 : i32
    %118 = tpu.dynamic_rotate %99 by %c1_i32_104 dim 1 : vector<3x256xf32>, i32 -> vector<3x256xf32>
    %c3_105 = arith.constant 3 : index
    %c0_106 = arith.constant 0 : index
    %119 = vector.load %arg5[%c3_105, %c0_106] : memref<9x256xf32, #tpu.memory_space<vmem>>, vector<1x256xf32>
    %120 = vector.broadcast %119 : vector<1x256xf32> to vector<3x256xf32>
    %121 = arith.mulf %118, %120 : vector<3x256xf32>
    %c9 = arith.constant 9 : index
    %c0_107 = arith.constant 0 : index
    %122 = vector.load %arg9[%c9, %c0_107] : memref<27x256xf32, #tpu.memory_space<vmem>>, vector<3x256xf32>
    tpu.vector_store %arg9[%c9, %c0_107], %121 {strides = array<i32>} : memref<27x256xf32, #tpu.memory_space<vmem>>, vector<3x256xf32>,
    %c12 = arith.constant 12 : index
    %c0_108 = arith.constant 0 : index
    %123 = vector.load %arg9[%c12, %c0_108] : memref<27x256xf32, #tpu.memory_space<vmem>>, vector<3x256xf32>
    tpu.vector_store %arg9[%c12, %c0_108], %99 {strides = array<i32>} : memref<27x256xf32, #tpu.memory_space<vmem>>, vector<3x256xf32>,
    %c255_i32_109 = arith.constant 255 : i32
    %124 = tpu.dynamic_rotate %99 by %c255_i32_109 dim 1 : vector<3x256xf32>, i32 -> vector<3x256xf32>
    %c5_110 = arith.constant 5 : index
    %c0_111 = arith.constant 0 : index
    %125 = vector.load %arg5[%c5_110, %c0_111] : memref<9x256xf32, #tpu.memory_space<vmem>>, vector<1x256xf32>
    %126 = vector.broadcast %125 : vector<1x256xf32> to vector<3x256xf32>
    %127 = arith.mulf %124, %126 : vector<3x256xf32>
    %c15 = arith.constant 15 : index
    %c0_112 = arith.constant 0 : index
    %128 = vector.load %arg9[%c15, %c0_112] : memref<27x256xf32, #tpu.memory_space<vmem>>, vector<3x256xf32>
    tpu.vector_store %arg9[%c15, %c0_112], %127 {strides = array<i32>} : memref<27x256xf32, #tpu.memory_space<vmem>>, vector<3x256xf32>,
    %c241_i32_113 = arith.constant 241 : i32
    %129 = tpu.dynamic_rotate %99 by %c241_i32_113 dim 1 : vector<3x256xf32>, i32 -> vector<3x256xf32>
    %c6_114 = arith.constant 6 : index
    %c0_115 = arith.constant 0 : index
    %130 = vector.load %arg5[%c6_114, %c0_115] : memref<9x256xf32, #tpu.memory_space<vmem>>, vector<1x256xf32>
    %131 = vector.broadcast %130 : vector<1x256xf32> to vector<3x256xf32>
    %132 = arith.mulf %129, %131 : vector<3x256xf32>
    %c18 = arith.constant 18 : index
    %c0_116 = arith.constant 0 : index
    %133 = vector.load %arg9[%c18, %c0_116] : memref<27x256xf32, #tpu.memory_space<vmem>>, vector<3x256xf32>
    tpu.vector_store %arg9[%c18, %c0_116], %132 {strides = array<i32>} : memref<27x256xf32, #tpu.memory_space<vmem>>, vector<3x256xf32>,
    %c240_i32_117 = arith.constant 240 : i32
    %134 = tpu.dynamic_rotate %99 by %c240_i32_117 dim 1 : vector<3x256xf32>, i32 -> vector<3x256xf32>
    %c7_118 = arith.constant 7 : index
    %c0_119 = arith.constant 0 : index
    %135 = vector.load %arg5[%c7_118, %c0_119] : memref<9x256xf32, #tpu.memory_space<vmem>>, vector<1x256xf32>
    %136 = vector.broadcast %135 : vector<1x256xf32> to vector<3x256xf32>
    %137 = arith.mulf %134, %136 : vector<3x256xf32>
    %c21 = arith.constant 21 : index
    %c0_120 = arith.constant 0 : index
    %138 = vector.load %arg9[%c21, %c0_120] : memref<27x256xf32, #tpu.memory_space<vmem>>, vector<3x256xf32>
    tpu.vector_store %arg9[%c21, %c0_120], %137 {strides = array<i32>} : memref<27x256xf32, #tpu.memory_space<vmem>>, vector<3x256xf32>,
    %c239_i32_121 = arith.constant 239 : i32
    %139 = tpu.dynamic_rotate %99 by %c239_i32_121 dim 1 : vector<3x256xf32>, i32 -> vector<3x256xf32>
    %c8_122 = arith.constant 8 : index
    %c0_123 = arith.constant 0 : index
    %140 = vector.load %arg5[%c8_122, %c0_123] : memref<9x256xf32, #tpu.memory_space<vmem>>, vector<1x256xf32>
    %141 = vector.broadcast %140 : vector<1x256xf32> to vector<3x256xf32>
    %142 = arith.mulf %139, %141 : vector<3x256xf32>
    %c24 = arith.constant 24 : index
    %c0_124 = arith.constant 0 : index
    %143 = vector.load %arg9[%c24, %c0_124] : memref<27x256xf32, #tpu.memory_space<vmem>>, vector<3x256xf32>
    tpu.vector_store %arg9[%c24, %c0_124], %142 {strides = array<i32>} : memref<27x256xf32, #tpu.memory_space<vmem>>, vector<3x256xf32>,
    %c0_125 = arith.constant 0 : index
    %c0_126 = arith.constant 0 : index
    %144 = vector.load %arg4[%c0_125, %c0_126] : memref<4x27xf32, #tpu.memory_space<vmem>>, vector<4x27xf32>
    %c0_127 = arith.constant 0 : index
    %c0_128 = arith.constant 0 : index
    %145 = vector.load %arg9[%c0_127, %c0_128] : memref<27x256xf32, #tpu.memory_space<vmem>>, vector<27x256xf32>
    %cst_129 = arith.constant dense<0.000000e+00> : vector<4x256xf32>
    %146 = tpu.matmul %144, %145, %cst_129 {dimension_numbers = #tpu.dot_dimension_numbers<[1], [0], [0], [1], [0, 0, 1, 1], [], []>} : vector<4x27xf32>, vector<27x256xf32>, vector<4x256xf32> -> vector<4x256xf32>
    %147 = arith.negf %146 : vector<4x256xf32>
    %148 = math.exp %147 : vector<4x256xf32>
    %cst_130 = arith.constant 1.000000e+00 : f32
    %149 = vector.broadcast %cst_130 : f32 to vector<4x256xf32>
    %150 = arith.addf %149, %148 : vector<4x256xf32>
    %151 = arith.divf %149, %150 : vector<4x256xf32>
    %152 = arith.mulf %95, %151 : vector<4x256xf32>
    %153 = arith.addf %152, %1 : vector<4x256xf32>
    %c0_131 = arith.constant 0 : index
    %c0_132 = arith.constant 0 : index
    %c0_133 = arith.constant 0 : index
    %154 = vector.load %arg6[%c0_131, %c0_132, %c0_133] : memref<1x4x256xf32, #tpu.memory_space<vmem>>, vector<1x4x256xf32>
    %155 = vector.shape_cast %154 : vector<1x4x256xf32> to vector<4x256xf32>
    %156 = vector.shape_cast %153 : vector<4x256xf32> to vector<1x4x256xf32>
    tpu.vector_store %arg6[%c0_131, %c0_132, %c0_133], %156 {strides = array<i32>} : memref<1x4x256xf32, #tpu.memory_space<vmem>>, vector<1x4x256xf32>,
    return
  }
  func.func @transform_0(%arg0: i32) -> (i32, i32, i32) {
    %c0_i32 = arith.constant 0 : i32
    %c0_i32_0 = arith.constant 0 : i32
    %c0_i32_1 = arith.constant 0 : i32
    return %arg0, %c0_i32, %c0_i32_0 : i32, i32, i32
  }
  func.func @transform_1(%arg0: i32) -> (i32, i32, i32) {
    %c0_i32 = arith.constant 0 : i32
    %c0_i32_0 = arith.constant 0 : i32
    %c0_i32_1 = arith.constant 0 : i32
    return %arg0, %c0_i32, %c0_i32_0 : i32, i32, i32
  }
  func.func @transform_2(%arg0: i32) -> (i32, i32, i32) {
    %c0_i32 = arith.constant 0 : i32
    %c0_i32_0 = arith.constant 0 : i32
    %c0_i32_1 = arith.constant 0 : i32
    %c0_i32_2 = arith.constant 0 : i32
    return %c0_i32, %c0_i32_0, %c0_i32_1 : i32, i32, i32
  }
  func.func @transform_3(%arg0: i32) -> (i32, i32) {
    %c0_i32 = arith.constant 0 : i32
    %c0_i32_0 = arith.constant 0 : i32
    %c0_i32_1 = arith.constant 0 : i32
    return %c0_i32, %c0_i32_0 : i32, i32
  }
  func.func @transform_4(%arg0: i32) -> (i32, i32) {
    %c0_i32 = arith.constant 0 : i32
    %c0_i32_0 = arith.constant 0 : i32
    %c0_i32_1 = arith.constant 0 : i32
    return %c0_i32, %c0_i32_0 : i32, i32
  }
  func.func @transform_5(%arg0: i32) -> (i32, i32, i32) {
    %c0_i32 = arith.constant 0 : i32
    %c0_i32_0 = arith.constant 0 : i32
    %c0_i32_1 = arith.constant 0 : i32
    return %arg0, %c0_i32, %c0_i32_0 : i32, i32, i32
  }
  func.func @transform_6(%arg0: i32) -> (i32, i32, i32) {
    %c0_i32 = arith.constant 0 : i32
    %c0_i32_0 = arith.constant 0 : i32
    %c0_i32_1 = arith.constant 0 : i32
    return %arg0, %c0_i32, %c0_i32_0 : i32, i32, i32
  }
}

</mosaic_0001>

<bundles_post_ra>
// kernel: supervised_attention_module.1
= control target key start
LH: loop header
LB: loop body
LE: loop exit
PB: predicated region body
PF: predicated region fallthrough
CT: control target
= control target key end

     0   :  { %s1414_s21 = smov 0   ;;  %s1685_s0 = inlined_call_operand.vmem [shape: f32[2,4,256], index: 0, kind: input, shape index: {}]   ;;  %s1686_s1 = inlined_call_operand.vmem [shape: f32[2,3,256], index: 1, kind: input, shape index: {}]   ;;  %s1687_s2 = inlined_call_operand.vmem [shape: bf16[9,7,4], index: 2, kind: input, shape index: {}]   ;;  %s1688_s3 = inlined_call_operand.vmem [shape: f32[4,27], index: 3, kind: input, shape index: {}]   ;;  %s1689_s4 = inlined_call_operand.vmem [shape: f32[9,256], index: 4, kind: input, shape index: {}]   ;;  %s1690_s5 = inlined_call_operand.vmem [shape: f32[2,4,256], index: 5, kind: output, shape index: {0}]   ;;  %s1691_s6 = inlined_call_operand.vmem [shape: f32[2,3,256], index: 6, kind: output, shape index: {1}]  }
   0x1 LB: > { %s1274_s22 = sadd.s32 4294967295, %s1369_s21   ;;  %p1278_p0 = scmp.ge.s32.totalorder %s1369_s21, 1  ;;  %s1369_s21 = sphi %s1414_s21, %s17_s21  }
   0x2   : > { %p225_p1 = scmp.lt.s32.totalorder %s1369_s21, 3 }
   0x4   : > { %p226_p2 = pnand %p1278_p0, %p225_p1 }
   0x5   : > { %p265_p3 = scmp.lt.s32.totalorder (!%p226_p2), %s1274_s22, 1  ;;  %s1371_s27 = smov (!%p226_p2), 17  }
   0x6   : > { %229 = sbr.rel (%p226_p2) target bundleno = 716 (0x2cc), region = 40  ;;  %s1372_s28 = smov (!%p226_p2), 16  }
   0x7   : > { %s1373_s29 = smov (!%p226_p2), 15   ;;  %s1374_s30 = smov (!%p226_p2), 1  }
   0x8   : > { %s1375_s7 = smov (!%p226_p2), 127   ;;  %s1376_s8 = smov (!%p226_p2), 113  }
   0x9   : > { %s1377_s9 = smov (!%p226_p2), 112   ;;  %s1378_s13 = smov (!%p226_p2), 111  }
   0xb   : > { %s1693_s22 = smov (!%p265_p3, %s1274_s22), 1  ;;  %v297_v21 = vlaneseq  ;;  %v1293_v23 = vld [vmem:[%s1689_s4 + $0x2] ss:$8 sm:$0x3]  ;;  %vm317_vm2 = vcmask 1041408   ;;  %vm313_vm4 = vcmask 31744  }
   0xc   : > { %s1422_s23 = sshll.u32 %s1693_s22, 3  ;;  %v433_v25 = vperm.slane %v1293_v23, 0  ;;  %v434_v26 = vperm.slane %v1293_v23, 1  ;;  %v302_v30 = vld [vmem:[%s1689_s4] ss:$8 sm:$0x3] }
   0xd   : > { %s269_s26 = scalar_lea.vmem %s1685_s0, %s1422_s23  ;;  %s274_s12 = scalar_lea.vmem %s1686_s1, %s1422_s23  ;;  %v1463_v22 = vand.u32 127, %v297_v21  ;;  %v304_v33 = vperm.slane %v302_v30, 0  ;;  %v305_v34 = vperm.slane %v302_v30, 1  ;;  %v1289_v43 = vld [vmem:[%s1689_s4 + $0x1] ss:$8 sm:$0x3] }
   0xe   : > { %v1428_v0 = vld [vmem:[%s269_s26] sm:$0xff]  ;;  %v367_v51 = vperm.slane %v1289_v43, 0  ;;  %v368_v52 = vperm.slane %v1289_v43, 1  ;;  %v1298_v23 = vld [vmem:[%s1687_s2 + $0xc] sm:$0xf]  ;;  %s284_s24 = scalar_lea.vmem %s1691_s6, %s1422_s23  ;;  %vm1073_vm10 = vcmask 1042432   ;;  %s279_s22 = scalar_lea.vmem %s1690_s5, %s1422_s23 }
   0xf   : > { %288 = vst [vmem:[#allocation1] ss:$2 sm:$0xff] %v1428_v0  ;;  %v868_v17 = vld [vmem:[%s274_s12] sm:$0x77]  ;;  %vm427_vm0 = vcmp.lt.s32.totalorder %v1463_v22, 15  ;;  %vm299_vm1 = vcmp.lt.s32.totalorder %v1463_v22, 17 }
  0x10   : > { %vm361_vm3 = vcmp.lt.s32.totalorder %v1463_v22, 16  ;;  %v310_v53 = vld [vmem:[%s1687_s2] sm:$0xf]  ;;  %vm493_vm5 = vcmp.lt.s32.totalorder %v1463_v22, 1  ;;  %vm609_vm6 = vcmp.lt.s32.totalorder %v1463_v22, 127  ;;  %vm675_vm7 = vcmp.lt.s32.totalorder %v1463_v22, 113 }
  0x11   : > { %v1297_v61 = vld [vmem:[%s1689_s4 + $0x3] ss:$8 sm:$0x3]  ;;  %v1312_v43 = vld [vmem:[%s1689_s4 + $0x7] ss:$8 sm:$0x3] }
  0x12   : > { %vm741_vm8 = vcmp.lt.s32.totalorder %v1463_v22, 112  ;;  %vm807_vm9 = vcmp.lt.s32.totalorder %v1463_v22, 111  ;;  %vm1069_vm11 = vcmask 220160  }
  0x16   : > { %v289_v1 = vld.sshfl [vmem:[#allocation1] sm:$0xff pattern:$0x75316420]  ;;  %v290_v2 = vld.sshfl [vmem:[#allocation1 + $0x8] sm:$0xff pattern:$0x75316420] }
  0x17   : > { %293 = vrot.lane.b32.xlu0 %v289_v1, %s1371_s27  ;;  %352 = vst [vmem:[#allocation1] ss:$2 sm:$0xff] %v1428_v0 }
  0x1e   : > { %v353_v3 = vld.sshfl [vmem:[#allocation1] sm:$0xff pattern:$0x75316420]  ;;  %v354_v4 = vld.sshfl [vmem:[#allocation1 + $0x8] sm:$0xff pattern:$0x75316420] }
  0x1f   : > { %295 = vrot.lane.b32.xlu0 %v290_v2, %s1371_s27  ;;  %357 = vrot.lane.b32.xlu1 %v353_v3, %s1372_s28  ;;  %418 = vst [vmem:[#allocation1] ss:$2 sm:$0xff] %v1428_v0 }
  0x26   : > { %v419_v5 = vld.sshfl [vmem:[#allocation1] sm:$0xff pattern:$0x75316420]  ;;  %v420_v6 = vld.sshfl [vmem:[#allocation1 + $0x8] sm:$0xff pattern:$0x75316420] }
  0x27   : > { %359 = vrot.lane.b32.xlu1 %v354_v4, %s1372_s28  ;;  %484 = vst [vmem:[#allocation1] ss:$2 sm:$0xff] %v1428_v0  ;;  %423 = vrot.lane.b32.xlu2 %v419_v5, %s1373_s29  ;;  %v499_v4 = vperm.slane %v1297_v61, 0  ;;  %v500_v5 = vperm.slane %v1297_v61, 1 }
  0x2e   : > { %v486_v7 = vld.sshfl [vmem:[#allocation1 + $0x8] sm:$0xff pattern:$0x75316420]  ;;  %v485_v8 = vld.sshfl [vmem:[#allocation1] sm:$0xff pattern:$0x75316420] }
  0x2f   : > { %491 = vrot.lane.b32.xlu1 %v486_v7, %s1374_s30  ;;  %489 = vrot.lane.b32.xlu0 %v485_v8, %s1374_s30  ;;  %552 = vst [vmem:[#allocation1] ss:$2 sm:$0xff] %v1428_v0 }
  0x30   : > { %425 = vrot.lane.b32.xlu2 %v420_v6, %s1373_s29  ;;  %v1290_v6 = vld [vmem:[%s1687_s2 + $0x4] sm:$0xf] }
  0x36   : > { %v1443_v9 = vld.sshfl [vmem:[#allocation1] sm:$0xff pattern:$0x75316420]  ;;  %v1445_v10 = vld.sshfl [vmem:[#allocation1 + $0x8] sm:$0xff pattern:$0x75316420] }
  0x37   : > { %600 = vst [vmem:[#allocation1] ss:$2 sm:$0xff] %v1428_v0  ;;  %v557_v46 = vpack.c.bf16 %v1443_v9, %v1443_v9  ;;  %v558_v60 = vpack.c.bf16 %v1445_v10, %v1445_v10 }
  0x39   : > { %v563_v55 = vsel %vm317_vm2, %v557_v46, 0  ;;  %v566_v1 = vsel %vm317_vm2, %v558_v60, 0 }
  0x3e   : > { %v602_v11 = vld.sshfl [vmem:[#allocation1 + $0x8] sm:$0xff pattern:$0x75316420]  ;;  %v601_v12 = vld.sshfl [vmem:[#allocation1] sm:$0xff pattern:$0x75316420] }
  0x3f   : > { %607 = vrot.lane.b32.xlu0 %v602_v11, %s1375_s7  ;;  %666 = vst [vmem:[#allocation1] ss:$2 sm:$0xff] %v1428_v0  ;;  %605 = vrot.lane.b32.xlu2 %v601_v12, %s1375_s7 }
  0x46   : > { %v667_v13 = vld.sshfl [vmem:[#allocation1] sm:$0xff pattern:$0x75316420]  ;;  %v668_v14 = vld.sshfl [vmem:[#allocation1 + $0x8] sm:$0xff pattern:$0x75316420] }
  0x47   : > { %671 = vrot.lane.b32.xlu1 %v667_v13, %s1376_s8  ;;  %732 = vst [vmem:[#allocation1] ss:$2 sm:$0xff] %v1428_v0  ;;  %673 = vrot.lane.b32.xlu2 %v668_v14, %s1376_s8 }
  0x4e   : > { %v734_v15 = vld.sshfl [vmem:[#allocation1 + $0x8] sm:$0xff pattern:$0x75316420]  ;;  %v733_v16 = vld.sshfl [vmem:[#allocation1] sm:$0xff pattern:$0x75316420] }
  0x4f   : > { %739 = vrot.lane.b32.xlu1 %v734_v15, %s1377_s9  ;;  %737 = vrot.lane.b32.xlu0 %v733_v16, %s1377_s9  ;;  %798 = vst [vmem:[#allocation1] ss:$2 sm:$0xff] %v1428_v0 }
  0x56   : > { %v800_v18 = vld.sshfl [vmem:[#allocation1 + $0x8] sm:$0xff pattern:$0x75316420]  ;;  %v799_v19 = vld.sshfl [vmem:[#allocation1] sm:$0xff pattern:$0x75316420] }
  0x57   : > { %805 = vrot.lane.b32.xlu0 %v800_v18, %s1378_s13  ;;  %803 = vrot.lane.b32.xlu2 %v799_v19, %s1378_s13  ;;  %871 = vst [vmem:[#allocation1 + $0x1] ss:$2 sm:$0xff] %v868_v17  ;;  %v1294_v17 = vld [vmem:[%s1687_s2 + $0x8] sm:$0xf] }
  0x58   : > { %v1304_v18 = vld [vmem:[%s1689_s4 + $0x5] ss:$8 sm:$0x3] }
  0x59   : > { %v615_v19 = vperm.slane %v1304_v18, 0 }
  0x81   : > { %v424_v20 = vpop.permute.xlu2 %423 }
  0x89   : > { %v294_v24 = vpop.permute.xlu0 %293 }
  0x8a   : > { %v426_v27 = vpop.permute.xlu2 %425 }
  0x8b   : > { %v428_v28 = vsel %vm427_vm0, %v424_v20, %v426_v27  ;;  %v429_v29 = vsel %vm427_vm0, %v426_v27, %v424_v20  ;;  %v616_v20 = vperm.slane %v1304_v18, 1 }
  0x8c   : > { %v437_v31 = vmul.f32 %v433_v25, %v429_v29  ;;  %v438_v32 = vmul.f32 %v434_v26, %v428_v28  ;;  %v1308_v29 = vld [vmem:[%s1689_s4 + $0x6] ss:$8 sm:$0x3] }
  0x8e   : > { %v441_v39 = vpack.c.bf16 %v437_v31, %v437_v31  ;;  %v442_v40 = vpack.c.bf16 %v438_v32, %v438_v32 }
  0x90   : > { %v447_v47 = vsel %vm317_vm2, %v441_v39, 0  ;;  %v450_v48 = vsel %vm317_vm2, %v442_v40, 0 }
  0x91   : > { %v296_v35 = vpop.permute.xlu0 %295  ;;  %v358_v36 = vpop.permute.xlu1 %357 }
  0x92   : > { %v300_v37 = vsel %vm299_vm1, %v294_v24, %v296_v35  ;;  %v301_v38 = vsel %vm299_vm1, %v296_v35, %v294_v24  ;;  %v681_v35 = vperm.slane %v1308_v29, 0 }
  0x93   : > { %v308_v41 = vmul.f32 %v304_v33, %v301_v38  ;;  %v309_v42 = vmul.f32 %v305_v34, %v300_v37  ;;  %v1301_v37 = vld [vmem:[%s1687_s2 + $0x10] sm:$0xf] }
  0x95   : > { %v311_v44 = vpack.c.bf16 %v308_v41, %v308_v41  ;;  %v312_v45 = vpack.c.bf16 %v309_v42, %v309_v42 }
  0x97   : > { %v319_v49 = vsel %vm317_vm2, %v311_v44, 0  ;;  %v322_v50 = vsel %vm317_vm2, %v312_v45, 0 }
  0x98   : > { %331 = vmatpush.bf16.msra.mxu0 %v319_v49  ;;  %344 = vmatpush.bf16.msra.mxu1 %v322_v50  ;;  %v748_v49 = vperm.slane %v1312_v43, 1  ;;  %v1305_v50 = vld [vmem:[%s1687_s2 + $0x14] sm:$0xf] }
  0x99   : > { %v360_v54 = vpop.permute.xlu1 %359  ;;  %v606_v21 = vpop.permute.xlu2 %605 }
  0x9a   : > { %v362_v56 = vsel %vm361_vm3, %v358_v36, %v360_v54  ;;  %v363_v57 = vsel %vm361_vm3, %v360_v54, %v358_v36  ;;  %v682_v36 = vperm.slane %v1308_v29, 1 }
  0x9b   : > { %1287 = vmatmul.msk.bf16.vlgmr.msra.gmra.mxu0 %vm313_vm4, %v310_v53  ;;  %v371_v58 = vmul.f32 %v367_v51, %v363_v57  ;;  %v372_v59 = vmul.f32 %v368_v52, %v362_v56  ;;  %1288 = vmatmul.msk.bf16.vlgmr.msra.gmra.mxu1 %vm313_vm4, %v310_v53  ;;  %v1316_v57 = vld [vmem:[%s1689_s4 + $0x10] ss:$8 sm:$0x3] }
  0x9c   : > { %459 = vmatpush.bf16.msrb.mxu0 %v447_v47  ;;  %472 = vmatpush.bf16.msrb.mxu1 %v450_v48  ;;  %v747_v48 = vperm.slane %v1312_v43, 0 }
  0x9d   : > { %v375_v62 = vpack.c.bf16 %v371_v58, %v371_v58  ;;  %v376_v63 = vpack.c.bf16 %v372_v59, %v372_v59 }
  0x9f   : > { %v381_v2 = vsel %vm317_vm2, %v375_v62, 0  ;;  %v384_v3 = vsel %vm317_vm2, %v376_v63, 0  ;;  %v813_v62 = vperm.slane %v1316_v57, 0  ;;  %v814_v63 = vperm.slane %v1316_v57, 1 }
  0xa0   : > { %575 = vmatpush.bf16.msra.mxu0 %v563_v55  ;;  %588 = vmatpush.bf16.msra.mxu1 %v566_v1 }
  0xa1   : > { %393 = vmatpush.bf16.msra.mxu2 %v381_v2  ;;  %406 = vmatpush.bf16.msra.mxu3 %v384_v3  ;;  %v492_v7 = vpop.permute.xlu1 %491  ;;  %v490_v8 = vpop.permute.xlu0 %489  ;;  %v1309_v2 = vld [vmem:[%s1687_s2 + $0x18] sm:$0xf] }
  0xa2   : > { %v494_v9 = vsel %vm493_vm5, %v490_v8, %v492_v7  ;;  %v495_v10 = vsel %vm493_vm5, %v492_v7, %v490_v8  ;;  %v674_v34 = vpop.permute.xlu2 %673 }
  0xa3   : > { %v503_v11 = vmul.f32 %v499_v4, %v495_v10  ;;  %v504_v12 = vmul.f32 %v500_v5, %v494_v9 }
  0xa4   : > { %1291 = vmatmul.msk.bf16.vlgmr.msra.gmra.mxu2 %vm313_vm4, %v1290_v6  ;;  %1292 = vmatmul.msk.bf16.vlgmr.msra.gmra.mxu3 %vm313_vm4, %v1290_v6 }
  0xa5   : > { %v507_v13 = vpack.c.bf16 %v503_v11, %v503_v11  ;;  %v508_v14 = vpack.c.bf16 %v504_v12, %v504_v12  ;;  %v1313_v12 = vld [vmem:[%s1687_s2 + $0x1c] sm:$0xf] }
  0xa7   : > { %v513_v15 = vsel %vm317_vm2, %v507_v13, 0  ;;  %v516_v16 = vsel %vm317_vm2, %v508_v14, 0  ;;  %v1317_v13 = vld [vmem:[%s1687_s2 + $0x20] sm:$0xf] }
  0xa8   : > { %525 = vmatpush.bf16.msrb.mxu2 %v513_v15  ;;  %538 = vmatpush.bf16.msrb.mxu3 %v516_v16 }
  0xab   : > { %1295 = vmatmul.msk.bf16.vlgmr.msrb.gmra.mxu0 %vm313_vm4, %v1294_v17  ;;  %1296 = vmatmul.msk.bf16.vlgmr.msrb.gmra.mxu1 %vm313_vm4, %v1294_v17 }
  0xb1   : > { %v608_v24 = vpop.permute.xlu0 %607  ;;  %v804_v1 = vpop.permute.xlu2 %803 }
  0xb2   : > { %v610_v25 = vsel %vm609_vm6, %v606_v21, %v608_v24  ;;  %v611_v26 = vsel %vm609_vm6, %v608_v24, %v606_v21 }
  0xb3   : > { %v619_v27 = vmul.f32 %v615_v19, %v610_v25  ;;  %v620_v28 = vmul.f32 %v616_v20, %v611_v26 }
  0xb4   : > { %1299 = vmatmul.msk.bf16.vlgmr.msrb.gmra.mxu2 %vm313_vm4, %v1298_v23  ;;  %1300 = vmatmul.msk.bf16.vlgmr.msrb.gmra.mxu3 %vm313_vm4, %v1298_v23 }
  0xb5   : > { %v623_v30 = vpack.c.bf16 %v619_v27, %v619_v27  ;;  %v624_v31 = vpack.c.bf16 %v620_v28, %v620_v28 }
  0xb7   : > { %v629_v32 = vsel %vm317_vm2, %v623_v30, 0  ;;  %v632_v33 = vsel %vm317_vm2, %v624_v31, 0 }
  0xb8   : > { %641 = vmatpush.bf16.msra.mxu2 %v629_v32  ;;  %654 = vmatpush.bf16.msra.mxu3 %v632_v33 }
  0xb9   : > { %v672_v38 = vpop.permute.xlu1 %671 }
  0xba   : > { %v676_v39 = vsel %vm675_vm7, %v672_v38, %v674_v34  ;;  %v677_v40 = vsel %vm675_vm7, %v674_v34, %v672_v38 }
  0xbb   : > { %1302 = vmatmul.msk.bf16.vlgmr.msra.gmra.mxu0 %vm313_vm4, %v1301_v37  ;;  %v685_v41 = vmul.f32 %v681_v35, %v676_v39  ;;  %v686_v42 = vmul.f32 %v682_v36, %v677_v40  ;;  %1303 = vmatmul.msk.bf16.vlgmr.msra.gmra.mxu1 %vm313_vm4, %v1301_v37 }
  0xbd   : > { %v689_v44 = vpack.c.bf16 %v685_v41, %v685_v41  ;;  %v690_v45 = vpack.c.bf16 %v686_v42, %v686_v42 }
  0xbf   : > { %v695_v46 = vsel %vm317_vm2, %v689_v44, 0  ;;  %v698_v47 = vsel %vm317_vm2, %v690_v45, 0 }
  0xc0   : > { %707 = vmatpush.bf16.msrb.mxu0 %v695_v46  ;;  %720 = vmatpush.bf16.msrb.mxu1 %v698_v47 }
  0xc1   : > { %v740_v51 = vpop.permute.xlu1 %739  ;;  %v738_v52 = vpop.permute.xlu0 %737 }
  0xc2   : > { %v742_v53 = vsel %vm741_vm8, %v738_v52, %v740_v51  ;;  %v743_v54 = vsel %vm741_vm8, %v740_v51, %v738_v52 }
  0xc3   : > { %v751_v55 = vmul.f32 %v747_v48, %v742_v53  ;;  %v752_v56 = vmul.f32 %v748_v49, %v743_v54 }
  0xc4   : > { %1306 = vmatmul.msk.bf16.vlgmr.msra.gmra.mxu2 %vm313_vm4, %v1305_v50  ;;  %1307 = vmatmul.msk.bf16.vlgmr.msra.gmra.mxu3 %vm313_vm4, %v1305_v50 }
  0xc5   : > { %v755_v58 = vpack.c.bf16 %v751_v55, %v751_v55  ;;  %v756_v59 = vpack.c.bf16 %v752_v56, %v752_v56 }
  0xc7   : > { %v761_v60 = vsel %vm317_vm2, %v755_v58, 0  ;;  %v764_v61 = vsel %vm317_vm2, %v756_v59, 0 }
  0xc8   : > { %773 = vmatpush.bf16.msrb.mxu2 %v761_v60  ;;  %786 = vmatpush.bf16.msrb.mxu3 %v764_v61 }
  0xc9   : > { %v806_v3 = vpop.permute.xlu0 %805 }
  0xca   : > { %v808_v4 = vsel %vm807_vm9, %v804_v1, %v806_v3  ;;  %v809_v5 = vsel %vm807_vm9, %v806_v3, %v804_v1 }
  0xcb   : > { %1310 = vmatmul.msk.bf16.vlgmr.msrb.gmra.mxu0 %vm313_vm4, %v1309_v2  ;;  %1311 = vmatmul.msk.bf16.vlgmr.msrb.gmra.mxu1 %vm313_vm4, %v1309_v2  ;;  %v817_v6 = vmul.f32 %v813_v62, %v808_v4  ;;  %v818_v7 = vmul.f32 %v814_v63, %v809_v5 }
  0xcd   : > { %v821_v8 = vpack.c.bf16 %v817_v6, %v817_v6  ;;  %v822_v9 = vpack.c.bf16 %v818_v7, %v818_v7 }
  0xcf   : > { %v827_v10 = vsel %vm317_vm2, %v821_v8, 0  ;;  %v830_v11 = vsel %vm317_vm2, %v822_v9, 0 }
  0xd0   : > { %839 = vmatpush.bf16.msra.mxu0 %v827_v10  ;;  %852 = vmatpush.bf16.msra.mxu1 %v830_v11 }
  0xd4   : > { %1314 = vmatmul.msk.bf16.vlgmr.msrb.gmra.mxu2 %vm313_vm4, %v1313_v12  ;;  %1315 = vmatmul.msk.bf16.vlgmr.msrb.gmra.mxu3 %vm313_vm4, %v1313_v12 }
  0xdb   : > { %1318 = vmatmul.msk.bf16.vlgmr.msra.gmra.mxu0 %vm313_vm4, %v1317_v13  ;;  %1319 = vmatmul.msk.bf16.vlgmr.msra.gmra.mxu1 %vm313_vm4, %v1317_v13  ;;  %vm1170_vm4 = vcmask 1043456  }
 0x118   : > { %v333_v14 = vpop.f32.mrf.mxu0  ;;  %v346_v15 = vpop.f32.mrf.mxu1 }
 0x119   : > { %350 = vst [vmem:[#allocation2] sm:$0x7f] %v333_v14 }
 0x11a   : > { %351 = vst [vmem:[#allocation2 + $0x8] sm:$0x7f] %v346_v15 }
 0x120   : > { %v335_v16 = vpop.f32.mrf.mxu0  ;;  %v348_v17 = vpop.f32.mrf.mxu1  ;;  %v412_v18 = vld [vmem:[#allocation2] sm:$0x7f] }
 0x121   : > { %v413_v19 = vld [vmem:[#allocation2 + $0x8] sm:$0x7f] }
 0x127   : > { %v395_v20 = vpop.f32.mrf.mxu2  ;;  %v408_v21 = vpop.f32.mrf.mxu3 }
 0x128   : > { %v414_v23 = vadd.f32 %v412_v18, %v395_v20  ;;  %v415_v24 = vadd.f32 %v413_v19, %v408_v21  ;;  %v461_v25 = vpop.f32.mrf.mxu0  ;;  %v474_v26 = vpop.f32.mrf.mxu1  ;;  %v872_v20 = vld.sshfl [vmem:[#allocation1] sm:$0xff pattern:$0x75316420]  ;;  %v873_v21 = vld.sshfl [vmem:[#allocation1 + $0x8] sm:$0xff pattern:$0x75316420] }
 0x12a   : > { %416 = vst [vmem:[#allocation2] sm:$0x7f] %v414_v23 }
 0x12b   : > { %417 = vst [vmem:[#allocation2 + $0x8] sm:$0x7f] %v415_v24 }
 0x12f   : > { %v397_v27 = vpop.f32.mrf.mxu2  ;;  %v410_v28 = vpop.f32.mrf.mxu3 }
 0x130   : > { %v463_v30 = vpop.f32.mrf.mxu0  ;;  %v476_v31 = vpop.f32.mrf.mxu1 }
 0x131   : > { %v478_v29 = vld [vmem:[#allocation2] sm:$0x7f] }
 0x132   : > { %v480_v32 = vadd.f32 %v478_v29, %v461_v25  ;;  %v479_v33 = vld [vmem:[#allocation2 + $0x8] sm:$0x7f]  ;;  %v1323_v30 = vld [vmem:[%s1689_s4 + $0x5] ss:$8 sm:$0x3] }
 0x133   : > { %v481_v34 = vadd.f32 %v479_v33, %v474_v26  ;;  %v984_v31 = vperm.slane %v1323_v30, 0 }
 0x134   : > { %482 = vst [vmem:[#allocation2] sm:$0x7f] %v480_v32  ;;  %v985_v32 = vperm.slane %v1323_v30, 1 }
 0x135   : > { %483 = vst [vmem:[#allocation2 + $0x8] sm:$0x7f] %v481_v34 }
 0x137   : > { %v527_v35 = vpop.f32.mrf.mxu2  ;;  %v540_v36 = vpop.f32.mrf.mxu3 }
 0x138   : > { %v577_v37 = vpop.f32.mrf.mxu0  ;;  %v590_v38 = vpop.f32.mrf.mxu1 }
 0x13b   : > { %v544_v39 = vld [vmem:[#allocation2] sm:$0x7f] }
 0x13c   : > { %v546_v40 = vadd.f32 %v544_v39, %v527_v35  ;;  %v545_v41 = vld [vmem:[#allocation2 + $0x8] sm:$0x7f] }
 0x13d   : > { %v547_v42 = vadd.f32 %v545_v41, %v540_v36  ;;  %v1324_v41 = vld [vmem:[%s1689_s4 + $0x6] ss:$8 sm:$0x3] }
 0x13e   : > { %548 = vst [vmem:[#allocation2] sm:$0x7f] %v546_v40  ;;  %v1325_v40 = vld [vmem:[%s1689_s4 + $0x7] ss:$8 sm:$0x3] }
 0x13f   : > { %549 = vst [vmem:[#allocation2 + $0x8] sm:$0x7f] %v547_v42  ;;  %v529_v43 = vpop.f32.mrf.mxu2  ;;  %v542_v44 = vpop.f32.mrf.mxu3 }
 0x140   : > { %v579_v45 = vpop.f32.mrf.mxu0  ;;  %v592_v46 = vpop.f32.mrf.mxu1  ;;  %v1030_v44 = vperm.slane %v1325_v40, 0 }
 0x141   : > { %v1031_v45 = vperm.slane %v1325_v40, 1  ;;  %v1008_v46 = vperm.slane %v1324_v41, 0 }
 0x145   : > { %v594_v47 = vld [vmem:[#allocation2] sm:$0x7f] }
 0x146   : > { %v596_v48 = vadd.f32 %v594_v47, %v577_v37  ;;  %v595_v49 = vld [vmem:[#allocation2 + $0x8] sm:$0x7f]  ;;  %v1009_v47 = vperm.slane %v1324_v41, 1 }
 0x147   : > { %v597_v50 = vadd.f32 %v595_v49, %v590_v38  ;;  %v643_v51 = vpop.f32.mrf.mxu2  ;;  %v656_v52 = vpop.f32.mrf.mxu3 }
 0x148   : > { %598 = vst [vmem:[#allocation2] sm:$0x7f] %v596_v48  ;;  %v709_v53 = vpop.f32.mrf.mxu0  ;;  %v722_v54 = vpop.f32.mrf.mxu1 }
 0x149   : > { %599 = vst [vmem:[#allocation2 + $0x8] sm:$0x7f] %v597_v50 }
 0x14f   : > { %v660_v55 = vld [vmem:[#allocation2] sm:$0x7f]  ;;  %v645_v56 = vpop.f32.mrf.mxu2  ;;  %v658_v57 = vpop.f32.mrf.mxu3 }
 0x150   : > { %v662_v58 = vadd.f32 %v660_v55, %v643_v51  ;;  %v661_v59 = vld [vmem:[#allocation2 + $0x8] sm:$0x7f]  ;;  %v711_v61 = vpop.f32.mrf.mxu0  ;;  %v724_v62 = vpop.f32.mrf.mxu1 }
 0x151   : > { %v663_v60 = vadd.f32 %v661_v59, %v656_v52 }
 0x152   : > { %664 = vst [vmem:[#allocation2] sm:$0x7f] %v662_v58  ;;  %v1326_v58 = vld [vmem:[%s1689_s4 + $0x10] ss:$8 sm:$0x3] }
 0x153   : > { %665 = vst [vmem:[#allocation2 + $0x8] sm:$0x7f] %v663_v60 }
 0x157   : > { %v775_v63 = vpop.f32.mrf.mxu2  ;;  %v788_v1 = vpop.f32.mrf.mxu3 }
 0x158   : > { %v841_v3 = vpop.f32.mrf.mxu0  ;;  %v854_v4 = vpop.f32.mrf.mxu1 }
 0x159   : > { %v726_v2 = vld [vmem:[#allocation2] sm:$0x7f] }
 0x15a   : > { %v728_v5 = vadd.f32 %v726_v2, %v709_v53  ;;  %v727_v6 = vld [vmem:[#allocation2 + $0x8] sm:$0x7f]  ;;  %v1053_v2 = vperm.slane %v1326_v58, 1 }
 0x15b   : > { %v729_v7 = vadd.f32 %v727_v6, %v722_v54 }
 0x15c   : > { %730 = vst [vmem:[#allocation2] sm:$0x7f] %v728_v5 }
 0x15d   : > { %731 = vst [vmem:[#allocation2 + $0x8] sm:$0x7f] %v729_v7 }
 0x15f   : > { %v777_v8 = vpop.f32.mrf.mxu2  ;;  %v790_v9 = vpop.f32.mrf.mxu3 }
 0x160   : > { %v843_v10 = vpop.f32.mrf.mxu0  ;;  %v856_v11 = vpop.f32.mrf.mxu1  ;;  %v1322_v9 = vld [vmem:[%s1689_s4 + $0x3] ss:$8 sm:$0x3] }
 0x161   : > { %v1321_v10 = vld [vmem:[%s1689_s4 + $0x2] ss:$8 sm:$0x3] }
 0x163   : > { %v792_v12 = vld [vmem:[#allocation2] sm:$0x7f] }
 0x164   : > { %v794_v13 = vadd.f32 %v792_v12, %v775_v63  ;;  %v793_v14 = vld [vmem:[#allocation2 + $0x8] sm:$0x7f]  ;;  %v960_v12 = vperm.slane %v1322_v9, 0 }
 0x165   : > { %v795_v15 = vadd.f32 %v793_v14, %v788_v1  ;;  %v1052_v1 = vperm.slane %v1326_v58, 0  ;;  %v936_v14 = vperm.slane %v1321_v10, 0 }
 0x166   : > { %796 = vst [vmem:[#allocation2] sm:$0x7f] %v794_v13  ;;  %v961_v13 = vperm.slane %v1322_v9, 1 }
 0x167   : > { %797 = vst [vmem:[#allocation2 + $0x8] sm:$0x7f] %v795_v15  ;;  %v937_v15 = vperm.slane %v1321_v10, 1 }
 0x16d   : > { %v858_v16 = vld [vmem:[#allocation2] sm:$0x7f] }
 0x16e   : > { %v860_v17 = vadd.f32 %v858_v16, %v841_v3  ;;  %v859_v18 = vld [vmem:[#allocation2 + $0x8] sm:$0x7f] }
 0x16f   : > { %v861_v19 = vadd.f32 %v859_v18, %v854_v4 }
 0x170   : > { %862 = vst [vmem:[#allocation2] sm:$0x7f] %v860_v17 }
 0x171   : > { %863 = vst [vmem:[#allocation2 + $0x8] sm:$0x7f] %v861_v19 }
 0x177   : > { %v866_v23 = vld [vmem:[#allocation2] sm:$0x70] }
 0x178   : > { %v867_v24 = vld [vmem:[#allocation2 + $0x8] sm:$0x70]  ;;  %v876_v25 = vadd.f32 %v872_v20, %v866_v23 }
 0x179   : > { %v877_v26 = vadd.f32 %v873_v21, %v867_v24 }
 0x17a   : > { %v886_v27 = vrot.slane %v876_v25, 4  ;;  %880 = vst.sshfl [vmem:[#allocation1] sm:$0xff pattern:$0x75316420] %v876_v25 }
 0x17b   : > { %v887_v28 = vrot.slane %v877_v26, 4  ;;  %881 = vst.sshfl [vmem:[#allocation1 + $0x8] sm:$0xff pattern:$0x75316420] %v877_v26 }
 0x17c   : > { %975 = vst [vmem:[#allocation3 + $0x18] sm:$0x70] %v877_v26  ;;  %1000 = vrot.lane.b32.xlu0 %v886_v27, %s1376_s8  ;;  %976 = vrot.lane.b32.xlu1 %v886_v27, %s1375_s7 }
 0x17d   : > { %978 = vrot.lane.b32.xlu2 %v887_v28, %s1375_s7  ;;  %974 = vst [vmem:[#allocation3 + $0x8] sm:$0x70] %v876_v25 }
 0x17e   : > { %1160 = vst [vmem:[#allocation1] ss:$2 sm:$0xff] %v1428_v0 }
 0x182   : > { %v883_v29 = vld [vmem:[#allocation1 + $0x1] ss:$2 sm:$0xff] }
 0x183   : > { %885 = vst [vmem:[%s284_s24] sm:$0x77] %v883_v29 }
 0x184   : > { %1024 = vrot.lane.b32.xlu0 %v887_v28, %s1377_s9  ;;  %1002 = vrot.lane.b32.xlu1 %v887_v28, %s1376_s8 }
 0x185   : > { %1022 = vrot.lane.b32.xlu2 %v886_v27, %s1377_s9 }
 0x18c   : > { %928 = vrot.lane.b32.xlu0 %v886_v27, %s1373_s29  ;;  %1044 = vrot.lane.b32.xlu1 %v886_v27, %s1378_s13 }
 0x18d   : > { %1046 = vrot.lane.b32.xlu2 %v887_v28, %s1378_s13 }
 0x194   : > { %954 = vrot.lane.b32.xlu0 %v887_v28, %s1374_s30  ;;  %930 = vrot.lane.b32.xlu1 %v887_v28, %s1373_s29 }
 0x195   : > { %952 = vrot.lane.b32.xlu2 %v886_v27, %s1374_s30 }
 0x19c   : > { %890 = vrot.lane.b32.xlu0 %v886_v27, %s1371_s27  ;;  %906 = vrot.lane.b32.xlu1 %v886_v27, %s1372_s28 }
 0x19d   : > { %908 = vrot.lane.b32.xlu2 %v887_v28, %s1372_s28 }
 0x1a4   : > { %892 = vrot.lane.b32.xlu1 %v887_v28, %s1371_s27  ;;  %v1320_v28 = vld [vmem:[%s1689_s4 + $0x1] ss:$8 sm:$0x3] }
 0x1d7   : > { %v979_v0 = vpop.permute.xlu2 %978 }
 0x1df   : > { %v1023_v37 = vpop.permute.xlu2 %1022 }
 0x1e7   : > { %v1047_v59 = vpop.permute.xlu2 %1046 }
 0x1ee   : > { %v1001_v33 = vpop.permute.xlu0 %1000  ;;  %v977_v34 = vpop.permute.xlu1 %976 }
 0x1ef   : > { %v980_v35 = vsel %vm609_vm6, %v977_v34, %v979_v0  ;;  %v981_v36 = vsel %vm609_vm6, %v979_v0, %v977_v34  ;;  %v953_v11 = vpop.permute.xlu2 %952 }
 0x1f0   : > { %v988_v38 = vmul.f32 %v984_v31, %v980_v35  ;;  %v989_v39 = vmul.f32 %v985_v32, %v981_v36  ;;  %v914_v35 = vperm.slane %v1320_v28, 0  ;;  %v915_v36 = vperm.slane %v1320_v28, 1  ;;  %v1162_v28 = vld.sshfl [vmem:[#allocation1 + $0x8] sm:$0xff pattern:$0x75316420] }
 0x1f2   : > { %v992_v42 = vrot.slane %v988_v38, 1  ;;  %v993_v43 = vrot.slane %v989_v39, 1 }
 0x1f4   : > { %996 = vst [vmem:[#allocation3 + $0x8] sm:$0x80] %v992_v42 }
 0x1f5   : > { %997 = vst [vmem:[#allocation3 + $0x18] sm:$0x80] %v993_v43 }
 0x1f6   : > { %998 = vst [vmem:[#allocation3 + $0x20] sm:$0x3] %v992_v42  ;;  %v1025_v48 = vpop.permute.xlu0 %1024  ;;  %v1003_v49 = vpop.permute.xlu1 %1002 }
 0x1f7   : > { %999 = vst [vmem:[#allocation3 + $0x38] sm:$0x3] %v993_v43  ;;  %v1026_v50 = vsel %vm741_vm8, %v1023_v37, %v1025_v48  ;;  %v1027_v51 = vsel %vm741_vm8, %v1025_v48, %v1023_v37  ;;  %v1004_v52 = vsel %vm675_vm7, %v1001_v33, %v1003_v49  ;;  %v1005_v53 = vsel %vm675_vm7, %v1003_v49, %v1001_v33  ;;  %v909_v37 = vpop.permute.xlu2 %908  ;;  %v896_v43 = vld [vmem:[%s1689_s4] ss:$8 sm:$0x3] }
 0x1f8   : > { %v1034_v54 = vmul.f32 %v1030_v44, %v1026_v50  ;;  %v1035_v55 = vmul.f32 %v1031_v45, %v1027_v51  ;;  %v1012_v56 = vmul.f32 %v1008_v46, %v1004_v52  ;;  %v1013_v57 = vmul.f32 %v1009_v47, %v1005_v53 }
 0x1f9   : > { %v898_v46 = vperm.slane %v896_v43, 0  ;;  %v899_v47 = vperm.slane %v896_v43, 1 }
 0x1fa   : > { %v1038_v60 = vrot.slane %v1034_v54, 3  ;;  %v1039_v61 = vrot.slane %v1035_v55, 3  ;;  %v1016_v62 = vrot.slane %v1012_v56, 6  ;;  %v1017_v63 = vrot.slane %v1013_v57, 6  ;;  %v1060_v56 = vld [vmem:[%s1688_s3] sm:$0xf] }
 0x1fc   : > { %1042 = vst [vmem:[#allocation3 + $0x20] sm:$0xe0] %v1038_v60 }
 0x1fd   : > { %1043 = vst [vmem:[#allocation3 + $0x38] sm:$0xe0] %v1039_v61 }
 0x1fe   : > { %1020 = vst [vmem:[#allocation3 + $0x20] sm:$0x1c] %v1016_v62  ;;  %v929_v3 = vpop.permute.xlu0 %928  ;;  %v1045_v4 = vpop.permute.xlu1 %1044 }
 0x1ff   : > { %1021 = vst [vmem:[#allocation3 + $0x38] sm:$0x1c] %v1017_v63  ;;  %v1048_v5 = vsel %vm807_vm9, %v1045_v4, %v1047_v59  ;;  %v1049_v6 = vsel %vm807_vm9, %v1047_v59, %v1045_v4 }
 0x200   : > { %v1056_v7 = vmul.f32 %v1052_v1, %v1048_v5  ;;  %v1057_v8 = vmul.f32 %v1053_v2, %v1049_v6 }
 0x202   : > { %1058 = vst [vmem:[#allocation3 + $0x30] sm:$0x7] %v1056_v7 }
 0x203   : > { %1059 = vst [vmem:[#allocation3] sm:$0x7] %v1057_v8 }
 0x205   : > { %v1065_v33 = vld [vmem:[#allocation3 + $0x20] sm:$0xff] }
 0x206   : > { %v955_v16 = vpop.permute.xlu0 %954  ;;  %v931_v17 = vpop.permute.xlu1 %930  ;;  %v1066_v34 = vld [vmem:[#allocation3 + $0x38] sm:$0xff] }
 0x207   : > { %v956_v18 = vsel %vm493_vm5, %v953_v11, %v955_v16  ;;  %v957_v19 = vsel %vm493_vm5, %v955_v16, %v953_v11  ;;  %v932_v20 = vsel %vm427_vm0, %v929_v3, %v931_v17  ;;  %v933_v21 = vsel %vm427_vm0, %v931_v17, %v929_v3 }
 0x208   : > { %v964_v23 = vmul.f32 %v960_v12, %v957_v19  ;;  %v965_v24 = vmul.f32 %v961_v13, %v956_v18  ;;  %v940_v25 = vmul.f32 %v936_v14, %v933_v21  ;;  %v941_v26 = vmul.f32 %v937_v15, %v932_v20 }
 0x209   : > { %v1067_v27 = vld [vmem:[#allocation3 + $0x30] sm:$0x7] }
 0x20a   : > { %v968_v29 = vrot.slane %v964_v23, 7  ;;  %v969_v0 = vrot.slane %v965_v24, 7  ;;  %v944_v30 = vrot.slane %v940_v25, 2  ;;  %1327 = vmatpush.msk.msra.mxu2 %vm1073_vm10, %v1067_v27  ;;  %v1068_v31 = vld [vmem:[#allocation3] sm:$0x7]  ;;  %v945_v32 = vrot.slane %v941_v26, 2 }
 0x20b   : > { %1329 = vmatpush.msk.msra.mxu3 %vm1073_vm10, %v1068_v31  ;;  %v864_v23 = vld [vmem:[#allocation2] sm:$0xf]  ;;  %v865_v24 = vld [vmem:[#allocation2 + $0x8] sm:$0xf] }
 0x20c   : > { %972 = vst [vmem:[#allocation3 + $0x8] sm:$0xe] %v968_v29  ;;  %1093 = vmatpush.msra.mxu2 %v1065_v33 }
 0x20d   : > { %973 = vst [vmem:[#allocation3 + $0x18] sm:$0xe] %v969_v0  ;;  %1113 = vmatpush.msra.mxu3 %v1066_v34  ;;  %v1161_v0 = vld.sshfl [vmem:[#allocation1] sm:$0xff pattern:$0x75316420] }
 0x20e   : > { %948 = vst [vmem:[#allocation3 + $0x28] sm:$0xc0] %v944_v30  ;;  %v907_v38 = vpop.permute.xlu1 %906  ;;  %v891_v48 = vpop.permute.xlu0 %890 }
 0x20f   : > { %949 = vst [vmem:[#allocation3 + $0x10] sm:$0xc0] %v945_v32  ;;  %v910_v39 = vsel %vm361_vm3, %v907_v38, %v909_v37  ;;  %v911_v40 = vsel %vm361_vm3, %v909_v37, %v907_v38 }
 0x210   : > { %950 = vst [vmem:[#allocation3 + $0x8] sm:$0x1] %v944_v30  ;;  %v918_v41 = vmul.f32 %v914_v35, %v911_v40  ;;  %v919_v42 = vmul.f32 %v915_v36, %v910_v39 }
 0x211   : > { %951 = vst [vmem:[#allocation3 + $0x18] sm:$0x1] %v945_v32 }
 0x212   : > { %v922_v44 = vrot.slane %v918_v41, 5  ;;  %v923_v45 = vrot.slane %v919_v42, 5 }
 0x214   : > { %926 = vst [vmem:[#allocation3 + $0x28] sm:$0x38] %v922_v44 }
 0x215   : > { %927 = vst [vmem:[#allocation3 + $0x10] sm:$0x38] %v923_v45 }
 0x216   : > { %v893_v49 = vpop.permute.xlu1 %892 }
 0x217   : > { %v1063_v50 = vld [vmem:[#allocation3 + $0x8] sm:$0xff]  ;;  %v894_v51 = vsel %vm299_vm1, %v891_v48, %v893_v49  ;;  %v895_v52 = vsel %vm299_vm1, %v893_v49, %v891_v48 }
 0x218   : > { %1094 = vmatpush.msra.mxu2 %v1063_v50  ;;  %v1064_v53 = vld [vmem:[#allocation3 + $0x18] sm:$0xff]  ;;  %v902_v54 = vmul.f32 %v898_v46, %v895_v52  ;;  %v903_v55 = vmul.f32 %v899_v47, %v894_v51 }
 0x219   : > { %1114 = vmatpush.msra.mxu3 %v1064_v53 }
 0x21a   : > { %904 = vst [vmem:[#allocation3 + $0x28] sm:$0x7] %v902_v54 }
 0x21b   : > { %905 = vst [vmem:[#allocation3 + $0x10] sm:$0x7] %v903_v55 }
 0x221   : > { %v1061_v57 = vld [vmem:[#allocation3 + $0x28] sm:$0xff] }
 0x222   : > { %1095 = vmatpush.msra.mxu2 %v1061_v57  ;;  %v1062_v58 = vld [vmem:[#allocation3 + $0x10] sm:$0xff] }
 0x223   : > { %1115 = vmatpush.msra.mxu3 %v1062_v58  ;;  %1328 = vmatmul.msk.f32.vlgmr.msra.gmra.mxu2 %vm1069_vm11, %v1060_v56 }
 0x224   : > { %1330 = vmatmul.msk.f32.vlgmr.msra.gmra.mxu3 %vm1069_vm11, %v1060_v56 }
 0x2a6   : > { %v1097_v22 = vpop.f32.mrf.mxu2 }
 0x2a7   : > { %v1331_v59 = vmul.f32 -1.442695, %v1097_v22  ;;  %v1117_v60 = vpop.f32.mrf.mxu3 }
 0x2a8   : > { %v1332_v61 = vmul.f32 -1.442695, %v1117_v60 }
 0x2a9   : > { %1355 = vpow2.f32 %v1331_v59 }
 0x2aa   : > { %1357 = vpow2.f32 %v1332_v61 }
 0x2af   : > { %v1356_v62 = vpop.eup %1355 }
 0x2b0   : > { %v1358_v63 = vpop.eup %1357  ;;  %v1126_v1 = vadd.f32 1.0, %v1356_v62 }
 0x2b1   : > { %v1127_v2 = vadd.f32 1.0, %v1358_v63 }
 0x2b2   : > { %1359 = vrcp.f32 %v1126_v1  ;;  %v1139_v8 = vand.u32 2147483648, %v1126_v1  ;;  %v1137_v11 = vand.u32 2147483647, %v1126_v1  ;;  %vm1133_vm14 = vweird.f32 %v1126_v1 }
 0x2b3   : > { %1361 = vrcp.f32 %v1127_v2  ;;  %v1154_v12 = vand.u32 2147483648, %v1127_v2  ;;  %v1152_v14 = vand.u32 2147483647, %v1127_v2  ;;  %vm1148_vm0 = vweird.f32 %v1127_v2 }
 0x2b4   : > { %v1140_v16 = vor.u32 1.1754944e-38, %v1139_v8  ;;  %vm1138_vm1 = vcmp.eq.f32.partialorder %v1137_v11, 8.507059e+37 }
 0x2b5   : > { %v1155_v19 = vor.u32 1.1754944e-38, %v1154_v12  ;;  %vm1153_vm3 = vcmp.eq.f32.partialorder %v1152_v14, 8.507059e+37 }
 0x2b8   : > { %v1360_v3 = vpop.eup %1359 }
 0x2b9   : > { %v1362_v4 = vpop.eup %1361  ;;  %v1129_v5 = vmul.f32 %v1360_v3, %v1126_v1  ;;  %vm1134_vm12 = vweird.f32 %v1360_v3 }
 0x2ba   : > { %v1144_v6 = vmul.f32 %v1362_v4, %v1127_v2  ;;  %vm1149_vm13 = vweird.f32 %v1362_v4  ;;  %vm1135_vm15 = vmor %vm1133_vm14, %vm1134_vm12 }
 0x2bb   : > { %v1130_v7 = vsub.f32 1.0, %v1129_v5  ;;  %vm1150_vm2 = vmor %vm1148_vm0, %vm1149_vm13 }
 0x2bc   : > { %v1145_v9 = vsub.f32 1.0, %v1144_v6 }
 0x2bd   : > { %v1131_v10 = vmul.f32 %v1360_v3, %v1130_v7 }
 0x2be   : > { %v1146_v13 = vmul.f32 %v1362_v4, %v1145_v9 }
 0x2bf   : > { %v1132_v15 = vadd.f32 %v1360_v3, %v1131_v10 }
 0x2c0   : > { %v1147_v17 = vadd.f32 %v1362_v4, %v1146_v13 }
 0x2c1   : > { %v1136_v18 = vsel %vm1135_vm15, %v1360_v3, %v1132_v15 }
 0x2c2   : > { %v1141_v20 = vsel %vm1138_vm1, %v1140_v16, %v1136_v18  ;;  %v1151_v21 = vsel %vm1150_vm2, %v1362_v4, %v1147_v17 }
 0x2c3   : > { %v1156_v25 = vsel %vm1153_vm3, %v1155_v19, %v1151_v21  ;;  %v1158_v26 = vmul.f32 %v1141_v20, %v864_v23 }
 0x2c4   : > { %v1159_v27 = vmul.f32 %v1156_v25, %v865_v24 }
 0x2c5   : > { %v1165_v30 = vadd.f32 %v1161_v0, %v1158_v26 }
 0x2c6   : > { %v1166_v29 = vadd.f32 %v1162_v28, %v1159_v27 }
 0x2c8   : > { %v1169_v31 = vrot.slane %v1166_v29, 4 }
 0x2ca   : > { %v1171_v32 = vsel %vm1170_vm4, %v1165_v30, %v1169_v31 }
 0x2cb   : > { %1173 = vst [vmem:[%s279_s22] sm:$0xff] %v1171_v32 }
 0x2cc PF: > { %s17_s21 = sadd.s32 1, %s1369_s21  }
 0x2cd   : > { %p14_p4 = scmp.ge.s32.totalorder %s17_s21, 4  }
 0x2cf   :  { %16 = sbr.rel (!%p14_p4) target bundleno = 1 (0x1), region = 102 }

</bundles_post_ra>
